<compile_context>
chip_gen: v6e
topology: v6e:2x2x1
jax: 0.10.0
libtpu: 0.0.40
codegen_flags: <defaults>
</compile_context>

<pallas_src>
import functools

import jax
import jax.numpy as jnp
from jax.experimental import pallas as pl
from jax.experimental.pallas import tpu as pltpu


def _round_up(x, m):
    return ((x + m - 1) // m) * m


def _largest_divisor(n, limit, multiple_of):
    """Largest divisor of n that is <= limit and a multiple of `multiple_of`.

    Falls back to n itself (a full-dim block is always a legal BlockSpec dim).
    """
    best = 0
    d = multiple_of
    cap = min(n, limit)
    while d <= cap:
        if n % d == 0:
            best = d
        d += multiple_of
    return best if best > 0 else n


def _k1_vmem_bytes(ts, tn, K, Cp, resident):
    """Rough double-buffered VMEM footprint of kernel 1 (lane-padded tiles)."""
    kl = _round_up(K, 128)
    tsl = _round_up(ts, 128)
    patch = ts * kl * 2                        # bf16 patches block
    wgt = (Cp if resident else tn) * kl * 2    # bf16 weight (resident or tile)
    y = tn * tsl * 2                           # bf16 conv-output block
    stats = _round_up(tn, 8) * 128 * 4         # (tn, 2) f32, lane padded
    return 2 * (patch + wgt + y + stats)


def _pick_spatial_tile(msp, K, Cp, tn, resident, budget=36 * 1024 * 1024):
    """Spatial tile: bound padding waste without collapsing to tiny blocks."""
    cands = {512, 384, 256, 128}
    if msp <= 512:
        cands.add(_round_up(msp, 8))           # single tile, minimal padding
    cands = sorted(cands, reverse=True)

    def waste(ts):
        return _round_up(msp, ts) - msp

    # Prefer the largest tile with <= 12.5% padding waste that fits VMEM.
    for ts in cands:
        if waste(ts) * 8 <= msp and _k1_vmem_bytes(ts, tn, K, Cp, resident) <= budget:
            return ts
    # Otherwise minimize padding waste among VMEM-feasible candidates.
    feas = [ts for ts in cands if _k1_vmem_bytes(ts, tn, K, Cp, resident) <= budget]
    if not feas:
        # TODO(synk): add a K-reduction grid axis for extremely large Cin*KH*KW.
        feas = [min(cands)]
    return min(feas, key=lambda ts: (waste(ts), -ts))


# ----------------------------------------------------------------------------
# Kernel 1: conv-as-matmul (bf16 MXU, f32 accumulation), channel-major output,
#           plus per-block partial per-channel sum / sum-of-squares for BN.
# ----------------------------------------------------------------------------
def _conv_stats_kernel(p_ref, w_ref, y_ref, stats_ref, *, tn, slice_w):
    if slice_w:
        # Resident full weight (Cp, K): slice this block's tn channel rows.
        c = pl.program_id(2)
        w = w_ref[pl.ds(pl.multiple_of(c * tn, tn), tn), :]
    else:
        w = w_ref[...]                                        # (tn, K)
    # (tn, K) x (ts, K) contracted over K (lane dims of both operands -> MXU,
    # same pattern as attention scores), f32 accumulation.  The result is
    # already channel-major: (tn channels, ts spatial) -> no later transpose.
    y = jax.lax.dot_general(
        w, p_ref[...],
        dimension_numbers=(((1,), (1,)), ((), ())),
        preferred_element_type=jnp.float32)
    y_ref[...] = y.astype(y_ref.dtype)
    # Partial per-channel stats over this spatial tile (cheap XLU lane reduce),
    # one combined store.  Zero-padded spatial rows / channels contribute
    # exactly zero; the tiny partials are reduced in JAX afterwards.
    s1 = jnp.sum(y, axis=-1, keepdims=True)
    s2 = jnp.sum(y * y, axis=-1, keepdims=True)
    stats_ref[...] = jnp.concatenate([s1, s2], axis=1)        # (tn, 2)


def _conv_matmul_stats(patches, w2d, ts, tn, resident):
    N, msp_pad, K = patches.shape
    Cp = w2d.shape[0]
    nsb = msp_pad // ts
    nbc = Cp // tn

    if resident:
        # Weight resident in VMEM (constant index map -> DMA'd once).  Channel
        # axis innermost so the patches block is also reused across it.
        grid = (N, nsb, nbc)
        in_specs = [
            pl.BlockSpec((None, ts, K), lambda n, s, c: (n, s, 0)),
            pl.BlockSpec((Cp, K), lambda n, s, c: (0, 0)),
        ]
        out_specs = (
            pl.BlockSpec((None, tn, ts), lambda n, s, c: (n, c, s)),
            pl.BlockSpec((None, None, tn, 2), lambda n, s, c: (n, s, c, 0)),
        )
    else:
        # Large weight: stream (tn, K) tiles, channel axis OUTSIDE the spatial
        # axis so each weight tile stays resident across the inner s loop.
        grid = (N, nbc, nsb)
        in_specs = [
            pl.BlockSpec((None, ts, K), lambda n, c, s: (n, s, 0)),
            pl.BlockSpec((tn, K), lambda n, c, s: (c, 0)),
        ]
        out_specs = (
            pl.BlockSpec((None, tn, ts), lambda n, c, s: (n, c, s)),
            pl.BlockSpec((None, None, tn, 2), lambda n, c, s: (n, s, c, 0)),
        )

    kernel = functools.partial(_conv_stats_kernel, tn=tn,
                               slice_w=(resident and nbc > 1))
    est = _k1_vmem_bytes(ts, tn, K, Cp, resident)
    vmem_limit = min(48 * 1024 * 1024, max(32 * 1024 * 1024, int(est * 1.25)))

    return pl.pallas_call(
        kernel,
        out_shape=(
            jax.ShapeDtypeStruct((N, Cp, msp_pad), jnp.bfloat16),
            jax.ShapeDtypeStruct((N, nsb, Cp, 2), jnp.float32),
        ),
        grid_spec=pltpu.PrefetchScalarGridSpec(
            num_scalar_prefetch=0,
            grid=grid,
            in_specs=in_specs,
            out_specs=out_specs,
        ),
        compiler_params=pltpu.CompilerParams(
            dimension_semantics=("parallel", "parallel", "parallel"),
            vmem_limit_bytes=vmem_limit,
        ),
    )(patches, w2d)


# ----------------------------------------------------------------------------
# Kernel 2: purely elementwise BatchNorm affine + ReLU on channel-major blocks.
# ----------------------------------------------------------------------------
def _bn_relu_kernel(y_ref, scale_ref, shift_ref, o_ref):
    y = y_ref[...].astype(jnp.float32)                        # (cb, sb)
    o_ref[...] = jnp.maximum(y * scale_ref[...] + shift_ref[...], 0.0)


def _bn_relu(y, scale, shift, cb, sb):
    N, Cp, msp_pad = y.shape
    est = 2 * (cb * _round_up(sb, 128) * (2 + 4) + 2 * cb * 128 * 4)
    vmem_limit = min(48 * 1024 * 1024, max(32 * 1024 * 1024, int(est * 1.25)))
    return pl.pallas_call(
        _bn_relu_kernel,
        out_shape=jax.ShapeDtypeStruct((N, Cp, msp_pad), jnp.float32),
        grid_spec=pltpu.PrefetchScalarGridSpec(
            num_scalar_prefetch=0,
            grid=(N, Cp // cb, msp_pad // sb),
            in_specs=[
                pl.BlockSpec((None, cb, sb), lambda n, c, s: (n, c, s)),
                pl.BlockSpec((cb, 1), lambda n, c, s: (c, 0)),
                pl.BlockSpec((cb, 1), lambda n, c, s: (c, 0)),
            ],
            out_specs=pl.BlockSpec((None, cb, sb), lambda n, c, s: (n, c, s)),
        ),
        compiler_params=pltpu.CompilerParams(
            dimension_semantics=("parallel", "parallel", "parallel"),
            vmem_limit_bytes=vmem_limit,
        ),
    )(y, scale, shift)


# ----------------------------------------------------------------------------
# JAX glue: NHWC im2col (single concat), BN statistics, NCHW output.
# ----------------------------------------------------------------------------
def _im2col_nhwc(x, KH, KW, pad, stride):
    """x: (N, Cin, H, W) -> patches (N, OH*OW, KH*KW*Cin); K order = (kh, kw, cin)."""
    N, Cin, H, W = x.shape
    OH = (H + 2 * pad - KH) // stride + 1
    OW = (W + 2 * pad - KW) // stride + 1
    xh = jnp.transpose(x, (0, 2, 3, 1))                           # NHWC: transpose the
    xh = jnp.pad(xh, ((0, 0), (pad, pad), (pad, pad), (0, 0)))    # small activation, not
    cols = [xh[:, ki:ki + stride * OH:stride, kj:kj + stride * OW:stride, :]
            for ki in range(KH) for kj in range(KW)]              # the 9x patch tensor
    p = cols[0] if len(cols) == 1 else jnp.concatenate(cols, axis=-1)
    return p.reshape(N, OH * OW, KH * KW * Cin), OH, OW


@functools.partial(jax.jit, static_argnames=("pad", "stride", "eps"))
def general_conv_forward(x, weight, gamma, beta, *, pad, stride, eps=1e-5):
    """x: NCHW f32; weight: (Cout, Cin, KH, KW); returns NCHW f32."""
    N, Cin, H, W = x.shape
    Cout, _, KH, KW = weight.shape
    K = Cin * KH * KW

    # im2col in bf16 (native MXU operand dtype; halves patch bytes).  The
    # contraction dim K is left UNPADDED -- the MXU lane-masks it in-kernel.
    patches, OH, OW = _im2col_nhwc(x.astype(jnp.bfloat16), KH, KW, pad, stride)
    msp = OH * OW
    m_true = N * msp

    # Channel padding only to the sublane quantum (8); for the usual Cout % 8
    # == 0 case there is no channel padding and no final channel slice.
    Cp = _round_up(Cout, 8)
    tn = _largest_divisor(Cp, 256, 8)
    resident = Cp * _round_up(K, 128) * 2 <= 6 * 1024 * 1024

    ts = _pick_spatial_tile(msp, K, Cp, tn, resident)
    msp_pad = _round_up(msp, ts)
    if msp_pad != msp:
        patches = jnp.pad(patches, ((0, 0), (0, msp_pad - msp), (0, 0)))

    # Weight as (Cp, K) with the same (kh, kw, cin) K order as the patches.
    w2d = weight.transpose(0, 2, 3, 1).reshape(Cout, K)
    if Cp != Cout:
        w2d = jnp.pad(w2d, ((0, Cp - Cout), (0, 0)))
    w2d = w2d.astype(jnp.bfloat16)

    # Kernel 1: channel-major conv + partial stats, fully parallel grid.
    y, stats = _conv_matmul_stats(patches, w2d, ts, tn, resident)

    # BatchNorm2d training-mode batch statistics (biased var over N*OH*OW).
    sums = stats.sum(axis=(0, 1))                                 # (Cp, 2)
    mean = sums[:, 0] / m_true
    var = jnp.maximum(sums[:, 1] / m_true - mean * mean, 0.0)     # clamp cancellation
    if Cp != Cout:
        gamma = jnp.pad(gamma, (0, Cp - Cout))                    # padded chans -> 0
        beta = jnp.pad(beta, (0, Cp - Cout))
    scale = gamma * jax.lax.rsqrt(var + eps)
    shift = beta - mean * scale

    # Kernel 2: BN affine + ReLU (no transpose; y is already channel-major).
    cb = _largest_divisor(Cp, 512, 8)
    sb = _largest_divisor(msp_pad, 2048, 128)
    out3 = _bn_relu(y, scale[:, None].astype(jnp.float32),
                    shift[:, None].astype(jnp.float32), cb, sb)

    if Cp != Cout or msp_pad != msp:      # skipped entirely when already aligned
        out3 = out3[:, :Cout, :msp]
    return out3.reshape(N, Cout, OH, OW)


def init_general_conv_params(key, nin, nout, nker):
    # Conv2d: kaiming_normal_(mode='fan_out') -> std = sqrt(2/(nout*kh*kw)), bias=False
    fan_out = nout * nker * nker
    std = (2.0 / fan_out) ** 0.5
    weight = std * jax.random.normal(key, (nout, nin, nker, nker), jnp.float32)
    gamma = jnp.ones((nout,), jnp.float32)   # BN weight init: ones
    beta = jnp.zeros((nout,), jnp.float32)   # BN bias init: zeros
    return weight, gamma, beta


if __name__ == "__main__":
    key = jax.random.PRNGKey(0)
    kx, kw = jax.random.split(key)

    # GeneralConv(nin=4, nout=8, nker=3, pad=1, stride=1, bias=False)
    N, Cin, H, W = 2, 4, 16, 16
    Cout, nker, pad, stride = 8, 3, 1, 1

    x = jax.random.normal(kx, (N, Cin, H, W), jnp.float32)
    weight, gamma, beta = init_general_conv_params(kw, Cin, Cout, nker)

    out = general_conv_forward(x, weight, gamma, beta, pad=pad, stride=stride)
    out = jax.block_until_ready(out)

    # Pure-JAX f32 reference (conv -> training-mode BN -> ReLU).
    conv_ref = jax.lax.conv_general_dilated(
        x, weight, window_strides=(stride, stride),
        padding=[(pad, pad), (pad, pad)],
        dimension_numbers=("NCHW", "OIHW", "NCHW"))
    mean_r = conv_ref.mean(axis=(0, 2, 3))
    var_r = conv_ref.var(axis=(0, 2, 3))
    bn_ref = (conv_ref - mean_r[None, :, None, None]) / jnp.sqrt(
        var_r[None, :, None, None] + 1e-5) * gamma[None, :, None, None] + beta[None, :, None, None]
    ref = jnp.maximum(bn_ref, 0.0)

    assert out.shape == (N, Cout, H, W)
    # bf16 MXU inputs + bf16 intermediate -> compare against the f32 reference
    # with a correspondingly loosened tolerance (post-BN values are O(1)).
    max_err = float(jnp.max(jnp.abs(out - ref)))
    assert jnp.allclose(out, ref, atol=5e-2, rtol=5e-2), max_err
    print("KERNEL_OK")
</pallas_src>

<mosaic_0001>
module attributes {stable_mosaic.version = 11 : i64} {
  func.func @_conv_stats_kernel(%arg0: i32, %arg1: i32, %arg2: i32, %arg3: memref<1x256x36xbf16, #tpu.memory_space<vmem>>, %arg4: memref<8x36xbf16, #tpu.memory_space<vmem>>, %arg5: memref<1x8x256xbf16, #tpu.memory_space<vmem>>, %arg6: memref<1x1x8x2xf32, #tpu.memory_space<vmem>>) attributes {dimension_semantics = [#tpu.dimension_semantics<parallel>, #tpu.dimension_semantics<parallel>, #tpu.dimension_semantics<parallel>], iteration_bounds = array<i64: 2, 1, 1>, scalar_prefetch = 0 : i64, scratch_operands = 0 : i64, tpu.core_type = #tpu.core_type<tc>, window_params = [{transform_indices = @transform_0, window_bounds = array<i64: 1, 256, 36>}, {pipeline_mode = #tpu.pipeline_mode<synchronous>, transform_indices = @transform_1, window_bounds = array<i64: 8, 36>}, {transform_indices = @transform_2, window_bounds = array<i64: 1, 8, 256>}, {transform_indices = @transform_3, window_bounds = array<i64: 1, 1, 8, 2>}]} {
    %c0 = arith.constant 0 : index
    %c0_0 = arith.constant 0 : index
    %0 = vector.load %arg4[%c0, %c0_0] : memref<8x36xbf16, #tpu.memory_space<vmem>>, vector<8x36xbf16>
    %c0_1 = arith.constant 0 : index
    %c0_2 = arith.constant 0 : index
    %c0_3 = arith.constant 0 : index
    %1 = vector.load %arg3[%c0_1, %c0_2, %c0_3] : memref<1x256x36xbf16, #tpu.memory_space<vmem>>, vector<1x256x36xbf16>
    %2 = vector.shape_cast %1 : vector<1x256x36xbf16> to vector<256x36xbf16>
    %cst = arith.constant dense<0.000000e+00> : vector<8x256xf32>
    %3 = tpu.matmul %0, %2, %cst {dimension_numbers = #tpu.dot_dimension_numbers<[1], [1], [0], [0], [0, 0, 1, 0], [], []>} : vector<8x36xbf16>, vector<256x36xbf16>, vector<8x256xf32> -> vector<8x256xf32>
    %4 = arith.truncf %3 : vector<8x256xf32> to vector<8x256xbf16>
    %c0_4 = arith.constant 0 : index
    %c0_5 = arith.constant 0 : index
    %c0_6 = arith.constant 0 : index
    %5 = vector.load %arg5[%c0_4, %c0_5, %c0_6] : memref<1x8x256xbf16, #tpu.memory_space<vmem>>, vector<1x8x256xbf16>
    %6 = vector.shape_cast %5 : vector<1x8x256xbf16> to vector<8x256xbf16>
    %7 = vector.shape_cast %4 : vector<8x256xbf16> to vector<1x8x256xbf16>
    tpu.vector_store %arg5[%c0_4, %c0_5, %c0_6], %7 {strides = array<i32>} : memref<1x8x256xbf16, #tpu.memory_space<vmem>>, vector<1x8x256xbf16>,
    %cst_7 = arith.constant dense<0.000000e+00> : vector<8xf32>
    %8 = vector.multi_reduction <add>, %3, %cst_7 [1] : vector<8x256xf32> to vector<8xf32>
    %9 = vector.shape_cast %8 : vector<8xf32> to vector<8x1xf32>
    %10 = arith.mulf %3, %3 : vector<8x256xf32>
    %cst_8 = arith.constant dense<0.000000e+00> : vector<8xf32>
    %11 = vector.multi_reduction <add>, %10, %cst_8 [1] : vector<8x256xf32> to vector<8xf32>
    %12 = vector.shape_cast %11 : vector<8xf32> to vector<8x1xf32>
    %13 = tpu.concatenate %9, %12 in 1 : vector<8x1xf32>, vector<8x1xf32> -> vector<8x2xf32>
    %c0_9 = arith.constant 0 : index
    %c0_10 = arith.constant 0 : index
    %c0_11 = arith.constant 0 : index
    %c0_12 = arith.constant 0 : index
    %14 = vector.load %arg6[%c0_9, %c0_10, %c0_11, %c0_12] : memref<1x1x8x2xf32, #tpu.memory_space<vmem>>, vector<1x1x8x2xf32>
    %15 = vector.shape_cast %14 : vector<1x1x8x2xf32> to vector<8x2xf32>
    %16 = vector.shape_cast %13 : vector<8x2xf32> to vector<1x1x8x2xf32>
    tpu.vector_store %arg6[%c0_9, %c0_10, %c0_11, %c0_12], %16 {strides = array<i32>} : memref<1x1x8x2xf32, #tpu.memory_space<vmem>>, vector<1x1x8x2xf32>,
    return
  }
  func.func @transform_0(%arg0: i32, %arg1: i32, %arg2: i32) -> (i32, i32, i32) {
    %c0_i32 = arith.constant 0 : i32
    %c0_i32_0 = arith.constant 0 : i32
    return %arg0, %arg1, %c0_i32 : i32, i32, i32
  }
  func.func @transform_1(%arg0: i32, %arg1: i32, %arg2: i32) -> (i32, i32) {
    %c0_i32 = arith.constant 0 : i32
    %c0_i32_0 = arith.constant 0 : i32
    %c0_i32_1 = arith.constant 0 : i32
    return %c0_i32, %c0_i32_0 : i32, i32
  }
  func.func @transform_2(%arg0: i32, %arg1: i32, %arg2: i32) -> (i32, i32, i32) {
    %c0_i32 = arith.constant 0 : i32
    return %arg0, %arg2, %arg1 : i32, i32, i32
  }
  func.func @transform_3(%arg0: i32, %arg1: i32, %arg2: i32) -> (i32, i32, i32, i32) {
    %c0_i32 = arith.constant 0 : i32
    %c0_i32_0 = arith.constant 0 : i32
    return %arg0, %arg1, %arg2, %c0_i32 : i32, i32, i32, i32
  }
}

module attributes {stable_mosaic.version = 11 : i64} {
  func.func @_bn_relu_kernel(%arg0: i32, %arg1: i32, %arg2: i32, %arg3: memref<1x8x256xbf16, #tpu.memory_space<vmem>>, %arg4: memref<8x1xf32, #tpu.memory_space<vmem>>, %arg5: memref<8x1xf32, #tpu.memory_space<vmem>>, %arg6: memref<1x8x256xf32, #tpu.memory_space<vmem>>) attributes {dimension_semantics = [#tpu.dimension_semantics<parallel>, #tpu.dimension_semantics<parallel>, #tpu.dimension_semantics<parallel>], iteration_bounds = array<i64: 2, 1, 1>, scalar_prefetch = 0 : i64, scratch_operands = 0 : i64, tpu.core_type = #tpu.core_type<tc>, window_params = [{transform_indices = @transform_0, window_bounds = array<i64: 1, 8, 256>}, {transform_indices = @transform_1, window_bounds = array<i64: 8, 1>}, {transform_indices = @transform_2, window_bounds = array<i64: 8, 1>}, {transform_indices = @transform_3, window_bounds = array<i64: 1, 8, 256>}]} {
    %c0 = arith.constant 0 : index
    %c0_0 = arith.constant 0 : index
    %c0_1 = arith.constant 0 : index
    %0 = vector.load %arg3[%c0, %c0_0, %c0_1] : memref<1x8x256xbf16, #tpu.memory_space<vmem>>, vector<1x8x256xbf16>
    %1 = vector.shape_cast %0 : vector<1x8x256xbf16> to vector<8x256xbf16>
    %2 = arith.extf %1 : vector<8x256xbf16> to vector<8x256xf32>
    %c0_2 = arith.constant 0 : index
    %c0_3 = arith.constant 0 : index
    %3 = vector.load %arg4[%c0_2, %c0_3] : memref<8x1xf32, #tpu.memory_space<vmem>>, vector<8x1xf32>
    %4 = vector.broadcast %3 : vector<8x1xf32> to vector<8x256xf32>
    %5 = arith.mulf %2, %4 : vector<8x256xf32>
    %c0_4 = arith.constant 0 : index
    %c0_5 = arith.constant 0 : index
    %6 = vector.load %arg5[%c0_4, %c0_5] : memref<8x1xf32, #tpu.memory_space<vmem>>, vector<8x1xf32>
    %7 = vector.broadcast %6 : vector<8x1xf32> to vector<8x256xf32>
    %8 = arith.addf %5, %7 : vector<8x256xf32>
    %cst = arith.constant 0.000000e+00 : f32
    %9 = vector.broadcast %cst : f32 to vector<8x256xf32>
    %10 = arith.maximumf %8, %9 : vector<8x256xf32>
    %c0_6 = arith.constant 0 : index
    %c0_7 = arith.constant 0 : index
    %c0_8 = arith.constant 0 : index
    %11 = vector.load %arg6[%c0_6, %c0_7, %c0_8] : memref<1x8x256xf32, #tpu.memory_space<vmem>>, vector<1x8x256xf32>
    %12 = vector.shape_cast %11 : vector<1x8x256xf32> to vector<8x256xf32>
    %13 = vector.shape_cast %10 : vector<8x256xf32> to vector<1x8x256xf32>
    tpu.vector_store %arg6[%c0_6, %c0_7, %c0_8], %13 {strides = array<i32>} : memref<1x8x256xf32, #tpu.memory_space<vmem>>, vector<1x8x256xf32>,
    return
  }
  func.func @transform_0(%arg0: i32, %arg1: i32, %arg2: i32) -> (i32, i32, i32) {
    %c0_i32 = arith.constant 0 : i32
    return %arg0, %arg1, %arg2 : i32, i32, i32
  }
  func.func @transform_1(%arg0: i32, %arg1: i32, %arg2: i32) -> (i32, i32) {
    %c0_i32 = arith.constant 0 : i32
    %c0_i32_0 = arith.constant 0 : i32
    return %arg1, %c0_i32 : i32, i32
  }
  func.func @transform_2(%arg0: i32, %arg1: i32, %arg2: i32) -> (i32, i32) {
    %c0_i32 = arith.constant 0 : i32
    %c0_i32_0 = arith.constant 0 : i32
    return %arg1, %c0_i32 : i32, i32
  }
  func.func @transform_3(%arg0: i32, %arg1: i32, %arg2: i32) -> (i32, i32, i32) {
    %c0_i32 = arith.constant 0 : i32
    return %arg0, %arg1, %arg2 : i32, i32, i32
  }
}

</mosaic_0001>

<bundles_post_ra>
// kernel: general_conv_forward.3
= control target key start
LH: loop header
LB: loop body
LE: loop exit
PB: predicated region body
PF: predicated region fallthrough
CT: control target
= control target key end

     0   :  { %s526_s12 = smov 0   ;;  %s528_s13 = smov 0   ;;  %s565_s0 = inlined_call_operand.vmem [shape: bf16[2,8,256], index: 0, kind: input, shape index: {}]   ;;  %s566_s1 = inlined_call_operand.vmem [shape: f32[8,1], index: 1, kind: input, shape index: {}]   ;;  %s567_s2 = inlined_call_operand.vmem [shape: f32[8,1], index: 2, kind: input, shape index: {}]   ;;  %s568_s3 = inlined_call_operand.vmem [shape: f32[2,8,256], index: 3, kind: output, shape index: {}]  }
   0x1   :  { %s530_s14 = smov 0  }
   0x2 LB: > { %s32_s15 = sadd.s32 1, %s499_s13  ;;  %p446_p0 = scmp.ge.s32.totalorder %s503_s14, 1  ;;  %s503_s14 = sphi %s530_s14, %s13_s14   ;;  %s499_s13 = sphi %s528_s13, %s570_s13   ;;  %s495_s12 = sphi %s526_s12, %s569_s12  }
   0x3   : > { %p34_p1 = scmp.ge.s32.totalorder %s32_s15, 2  ;;  %p191_p2 = scmp.lt.s32.totalorder %s503_s14, 3 }
   0x5   : > { %s572_s15 = smov (%p34_p1, %s32_s15), 0  ;;  %p192_p3 = pnand %p446_p0, %p191_p2 }
   0x6   : > { %p240_p4 = scmp.lt.s32.totalorder (!%p192_p3), %s495_s12, 1 }
   0x7   : > { %195 = sbr.rel (%p192_p3) target bundleno = 147 (0x93), region = 32 }
   0xc   : > { %v278_v0 = vld [vmem:[%s566_s1] sm:$0xff]  ;;  %v505_v1 = vmov 0   ;;  %s574_s12 = smov (!%p240_p4, %s495_s12), 1 }
   0xd   : > { %480 = vset.pattern.permute.xlu0 %v505_v1  ;;  %v286_v2 = vld [vmem:[%s567_s2] sm:$0xff]  ;;  %s453_s20 = sshll.u32 %s574_s12, 3  ;;  %s454_s24 = sshll.u32 %s574_s12, 4 }
   0xe   : > { %281 = vperm.xlu0 %480, %v278_v0   ;;  %s251_s23 = scalar_lea.vmem %s565_s0, %s453_s20  ;;  %s273_s27 = scalar_lea.vmem %s568_s3, %s454_s24 }
   0xf   : > { %v275_v3 = vld [vmem:[%s251_s23] sm:$0xff] }
  0x10   : > { %v276_v4 = vunpack.c.l.bf16 %v275_v3  ;;  %v277_v5 = vunpack.c.h.bf16 %v275_v3 }
  0x12   : > { %289 = vperm.xlu0 %480, %v286_v2  }
  0x89   : > { %v282_v6 = vpop.permute.xlu0 %281 }
  0x8a   : > { %v284_v7 = vmul.f32 %v282_v6, %v276_v4  ;;  %v285_v8 = vmul.f32 %v282_v6, %v277_v5 }
  0x8d   : > { %v290_v9 = vpop.permute.xlu0 %289 }
  0x8e   : > { %v292_v10 = vadd.f32 %v290_v9, %v284_v7  ;;  %v293_v11 = vadd.f32 %v290_v9, %v285_v8 }
  0x90   : > { %v294_v12 = vmax.f32 %v292_v10, 0.0  ;;  %v295_v13 = vmax.f32 %v293_v11, 0.0 }
  0x92   : > { %296 = vst [vmem:[%s273_s27] sm:$0xff] %v294_v12  ;;  %297 = vst [vmem:[%s273_s27 + $0x8] sm:$0xff] %v295_v13 }
  0x93 PF: > { %s13_s14 = sadd.s32 1, %s503_s14   ;;  %s569_s12 = smov %s499_s13 }
  0x94   : > { %p10_p5 = scmp.ge.s32.totalorder %s13_s14, 4   ;;  %s570_s13 = smov %s572_s15 }
  0x96   :  { %12 = sbr.rel (!%p10_p5) target bundleno = 2 (0x2), region = 68 }

// kernel: general_conv_forward.2
= control target key start
LH: loop header
LB: loop body
LE: loop exit
PB: predicated region body
PF: predicated region fallthrough
CT: control target
= control target key end

     0   :  { %s782_s12 = smov 0   ;;  %s784_s13 = smov 0   ;;  %s861_s0 = inlined_call_operand.vmem [shape: bf16[2,256,36], index: 0, kind: input, shape index: {}]   ;;  %s862_s1 = inlined_call_operand.vmem [shape: bf16[8,36], index: 1, kind: input, shape index: {}]   ;;  %s863_s2 = inlined_call_operand.vmem [shape: bf16[2,8,256], index: 2, kind: output, shape index: {0}]   ;;  %s864_s3 = inlined_call_operand.vmem [shape: f32[2,1,8,2], index: 3, kind: output, shape index: {1}]  }
   0x1   :  { %s786_s14 = smov 0  }
   0x2 LB: > { %s33_s15 = sadd.s32 1, %s756_s13  ;;  %p643_p0 = scmp.ge.s32.totalorder %s760_s14, 1  ;;  %s760_s14 = sphi %s786_s14, %s14_s14   ;;  %s756_s13 = sphi %s784_s13, %s866_s13   ;;  %s752_s12 = sphi %s782_s12, %s865_s12  }
   0x3   : > { %p35_p1 = scmp.ge.s32.totalorder %s33_s15, 2  ;;  %p174_p2 = scmp.lt.s32.totalorder %s760_s14, 3 }
   0x5   : > { %s868_s15 = smov (%p35_p1, %s33_s15), 0  ;;  %p175_p3 = pnand %p643_p0, %p174_p2 }
   0x6   : > { %p221_p4 = scmp.lt.s32.totalorder (!%p175_p3), %s752_s12, 1 }
   0x7   : > { %178 = sbr.rel (%p175_p3) target bundleno = 422 (0x1a6), region = 28 }
   0xc   : > { %vm368_vm0 = vcmask 293888   ;;  %v255_v0 = vld [vmem:[%s862_s1] sm:$0xf]  ;;  %s870_s12 = smov (!%p221_p4, %s752_s12), 1  ;;  %vm478_vm1 = vcmask 7168   ;;  %vm480_vm2 = vcmask 15360  }
   0xd   : > { %688 = vmatprep.mubr.msk.bf16.mxu0 %vm368_vm0, %v255_v0  ;;  %s669_s18 = sshll.u32 %s870_s12, 7  ;;  %s670_s22 = sshll.u32 %s870_s12, 3 }
   0xe   : > { %s810_s21 = scalar_lea.vmem %s861_s0, %s669_s18  ;;  %s242_s25 = scalar_lea.vmem %s863_s2, %s670_s22 }
   0xf   : > { %v722_v1 = vld [vmem:[%s810_s21 + $0x78] sm:$0xff]   ;;  %v724_v3 = vld [vmem:[%s810_s21 + $0x70] sm:$0xff]   ;;  %v726_v7 = vld [vmem:[%s810_s21 + $0x68] sm:$0xff]   ;;  %s253_s28 = scalar_lea.vmem %s864_s3, %s670_s22 }
  0x10   : > { %v723_v2 = vld [vmem:[%s810_s21 + $0x38] sm:$0xff]   ;;  %690 = vmatprep.subr.msk.bf16.mxu0 %vm368_vm0, %v722_v1  ;;  %v725_v5 = vld [vmem:[%s810_s21 + $0x30] sm:$0xff]   ;;  %v727_v8 = vld [vmem:[%s810_s21 + $0x28] sm:$0xff]  }
  0x11   : > { %v394_v4 = vsel %vm368_vm0, %v723_v2, 0  ;;  %v391_v6 = vsel %vm368_vm0, %v725_v5, 0  ;;  %v388_v9 = vsel %vm368_vm0, %v727_v8, 0  ;;  %v728_v10 = vld [vmem:[%s810_s21 + $0x60] sm:$0xff]   ;;  %v730_v13 = vld [vmem:[%s810_s21 + $0x58] sm:$0xff]   ;;  %v732_v16 = vld [vmem:[%s810_s21 + $0x50] sm:$0xff]  }
  0x12   : > { %673 = vmatpush3.bf16.xpose.msra.mxu0 %v394_v4  ;;  %v729_v11 = vld [vmem:[%s810_s21 + $0x20] sm:$0xff]   ;;  %v731_v14 = vld [vmem:[%s810_s21 + $0x18] sm:$0xff]   ;;  %v733_v17 = vld [vmem:[%s810_s21 + $0x10] sm:$0xff]  }
  0x13   : > { %691 = vmatprep.subr.msk.bf16.mxu0 %vm368_vm0, %v724_v3  ;;  %v385_v12 = vsel %vm368_vm0, %v729_v11, 0  ;;  %v382_v15 = vsel %vm368_vm0, %v731_v14, 0  ;;  %v379_v18 = vsel %vm368_vm0, %v733_v17, 0  ;;  %v734_v19 = vld [vmem:[%s810_s21 + $0x48] sm:$0xff]   ;;  %v736_v22 = vld [vmem:[%s810_s21 + $0x40] sm:$0xff]  }
  0x14   : > { %v735_v20 = vld [vmem:[%s810_s21 + $0x8] sm:$0xff]   ;;  %v737_v23 = vld [vmem:[%s810_s21] sm:$0xff]  }
  0x15   : > { %v376_v21 = vsel %vm368_vm0, %v735_v20, 0  ;;  %v373_v24 = vsel %vm368_vm0, %v737_v23, 0 }
  0x1a   : > { %675 = vmatpush3.bf16.xpose.msra.mxu0 %v391_v6 }
  0x1b   : > { %692 = vmatprep.subr.msk.bf16.mxu0 %vm368_vm0, %v726_v7 }
  0x22   : > { %677 = vmatpush3.bf16.xpose.msra.mxu0 %v388_v9 }
  0x23   : > { %693 = vmatprep.subr.msk.bf16.mxu0 %vm368_vm0, %v728_v10 }
  0x2a   : > { %679 = vmatpush3.bf16.xpose.msra.mxu0 %v385_v12 }
  0x2b   : > { %694 = vmatprep.subr.msk.bf16.mxu0 %vm368_vm0, %v730_v13 }
  0x32   : > { %681 = vmatpush3.bf16.xpose.msra.mxu0 %v382_v15 }
  0x33   : > { %695 = vmatprep.subr.msk.bf16.mxu0 %vm368_vm0, %v732_v16 }
  0x3a   : > { %683 = vmatpush3.bf16.xpose.msra.mxu0 %v379_v18 }
  0x3b   : > { %696 = vmatprep.subr.msk.bf16.mxu0 %vm368_vm0, %v734_v19 }
  0x42   : > { %685 = vmatpush3.bf16.xpose.msra.mxu0 %v376_v21 }
  0x43   : > { %697 = vmatprep.subr.msk.bf16.mxu0 %vm368_vm0, %v736_v22 }
  0x4a   : > { %687 = vmatpush3.bf16.xpose.msra.mxu0 %v373_v24 }
  0x51   : > { %689 = vmatmul.mubr.msk.bf16.vlgmr.msra.gmra.mxu0 %vm368_vm0, %v255_v0 }
 0x111   : > { %v454_v25 = vpop.f32.mrf.mxu0 }
 0x112   : > { %v473_v31 = vmul.f32 %v454_v25, %v454_v25 }
 0x113   : > { %v456_v26 = vpop.f32.mrf.mxu0 }
 0x114   : > { %v671_v27 = vpack.c.bf16 %v456_v26, %v454_v25  ;;  %v470_v28 = vadd.f32 %v456_v26, %v454_v25  ;;  %v474_v29 = vmul.f32 %v456_v26, %v456_v26 }
 0x115   : > { %v458_v30 = vpop.f32.mrf.mxu0 }
 0x116   : > { %469 = vst [vmem:[%s242_s25] sm:$0xff] %v671_v27  ;;  %471 = vadd.xlane.f32.xlu0 %v470_v28  ;;  %v475_v33 = vadd.f32 %v474_v29, %v473_v31 }
 0x117   : > { %v459_v32 = vpop.f32.mrf.mxu0 }
 0x11a   : > { %476 = vadd.xlane.f32.xlu0 %v475_v33 }
 0x19f   : > { %v472_v34 = vpop.xlane.xlu0 %471 }
 0x1a3   : > { %v477_v35 = vpop.xlane.xlu0 %476 }
 0x1a4   : > { %v479_v36 = vsel %vm478_vm1, %v472_v34, %v477_v35 }
 0x1a5   : > { %481 = vst.msk [vmem:[%s253_s28] sm:$0xff] %vm480_vm2, %v479_v36 }
 0x1a6 PF: > { %s14_s14 = sadd.s32 1, %s760_s14   ;;  %s865_s12 = smov %s756_s13 }
 0x1a7   : > { %p11_p5 = scmp.ge.s32.totalorder %s14_s14, 4   ;;  %s866_s13 = smov %s868_s15 }
 0x1a9   :  { %13 = sbr.rel (!%p11_p5) target bundleno = 2 (0x2), region = 70 }

</bundles_post_ra>
